<compile_context>
chip_gen: v6e
topology: v6e:2x2x1
jax: 0.10.0
libtpu: 0.0.40
codegen_flags: <defaults>
</compile_context>

<pallas_src>
import functools

import jax
import jax.numpy as jnp
from jax import lax
from jax.experimental import pallas as pl
from jax.experimental.pallas import tpu as pltpu

_OUT_LANES = 128
_LANE = 128
_INT32_BYTES = 4


def _round_up(x: int, m: int) -> int:
    return ((x + m - 1) // m) * m


def _tpu_tuning():
    """Per-generation streaming budget (bytes per buffered block) + bf16 capability."""
    try:
        kind = jax.devices()[0].device_kind.lower()
    except Exception:
        kind = ""
    is_v5e = ("v5 lite" in kind) or ("v5e" in kind) or ("v5lite" in kind)
    # v5e's scoped-VMEM default is only 16 MiB -> smaller blocks there; v6e/v7x
    # (>=1.3 TB/s HBM, ~0.35 us/step overhead) want ~8 MiB streamed per block.
    budget = (4 if is_v5e else 8) * 1024 * 1024
    # bf16 element-wise path only where the VPU/EUP support bf16 (v6e / v7x).
    bf16_ok = (not is_v5e) and (("v6" in kind) or ("v7" in kind) or ("7x" in kind))
    return budget, bf16_ok


def _focal_loss_kernel(x_ref, t_ref, out_ref, *, gamma: float, n_total: int,
                       num_classes: int, tn: int, compute_dtype):
    i = pl.program_id(0)

    x = x_ref[...].astype(compute_dtype)          # [TN, C] (no-op cast on the f32 path)
    t = t_ref[...]                                # [TN, 1] int32

    # Lane-index iota as a single replicated row; broadcasting it along the
    # sublane axis (and t along lanes) is layout-free.
    col = lax.broadcasted_iota(jnp.int32, (1, num_classes), 1)   # [1, C]
    onehot = col == t                                            # [TN, C]

    # --- gather the target logit straight from raw x (independent of max/LSE) ---
    x_t = jnp.sum(jnp.where(onehot, x, 0.0), axis=1, keepdims=True).astype(jnp.float32)

    # --- log-sum-exp along the class (lane) axis; accumulate in f32 ---
    m = jnp.max(x, axis=1, keepdims=True)                        # [TN, 1]
    e = jnp.exp(x - m)                                           # element-wise, compute_dtype
    sum_exp = jnp.sum(e.astype(jnp.float32), axis=1, keepdims=True)
    lse_full = jnp.log(sum_exp) + m.astype(jnp.float32)          # [TN, 1]

    picked_logpt = x_t - lse_full                                # [TN, 1] = log p_t

    # --- focal modulation, only on the gathered [TN, 1] column ---
    pt = jnp.exp(picked_logpt)
    one_minus_pt = jnp.maximum(1.0 - pt, 0.0)
    if gamma == 0.0:
        factor = jnp.ones_like(one_minus_pt)
    elif gamma == 0.5:
        factor = jnp.sqrt(one_minus_pt)
    elif gamma == 1.0:
        factor = one_minus_pt
    elif gamma == 2.0:
        factor = one_minus_pt * one_minus_pt
    else:
        factor = one_minus_pt ** gamma
    mod = factor * picked_logpt                                  # [TN, 1]

    # --- mask grid-padding rows and invalid targets (select masking, so any
    #     NaN/Inf from garbage padded rows never reaches the sum) ---
    rows = i * tn + lax.broadcasted_iota(jnp.int32, mod.shape, 0)
    valid = (rows < n_total) & (t >= 0) & (t < num_classes)
    partial = jnp.sum(jnp.where(valid, mod, 0.0))

    out_ref[...] = jnp.full(out_ref.shape, partial, dtype=jnp.float32)


def _focal_loss_xla(logits, target, gamma):
    """Plain-XLA fallback (used only when the minimal block cannot fit VMEM)."""
    x = logits.astype(jnp.float32)
    n, c = x.shape
    logpt = jax.nn.log_softmax(x, axis=1)
    t = target.astype(jnp.int32)
    picked = jnp.take_along_axis(logpt, jnp.clip(t, 0, c - 1)[:, None], axis=1)[:, 0]
    pt = jnp.exp(picked)
    mod = (1.0 - pt) ** gamma * picked
    valid = (t >= 0) & (t < c)
    mod = jnp.where(valid, mod, 0.0)
    return -jnp.sum(mod) / jnp.maximum(jnp.sum(valid).astype(jnp.float32), 1.0)


def focal_loss(logits: jax.Array, target: jax.Array, gamma: float = 0.5) -> jax.Array:
    """logits: [N, C] float; target: [N] int. Returns scalar f32 loss."""
    n, c = logits.shape
    itemsize = jnp.dtype(logits.dtype).itemsize
    budget, bf16_ok = _tpu_tuning()

    # Per-row streamed bytes, including lane padding: logits pad C -> mult of
    # 128 lanes; the [N,1] int32 target tile pads its lane dim 1 -> 128.
    c_pad = _round_up(c, _LANE)
    row_bytes = c_pad * itemsize + _LANE * _INT32_BYTES

    align = 8 if itemsize >= 4 else (16 if itemsize == 2 else 32)
    if align * row_bytes > (16 << 20):
        # TODO(synk): class-tiled online-LSE variant so huge-C cases stay in
        # Pallas on v7x's 64 MiB VMEM; fall back to plain XLA for now.
        return _focal_loss_xla(logits, target, gamma)

    budget = max(budget, align * row_bytes)
    tn = max(align, (budget // row_bytes) // align * align)
    n_up = _round_up(n, align)
    tn = min(tn, n_up)
    # Guarantee >= 2 grid steps when possible so dimension_semantics="parallel"
    # actually spreads work across both v7x TensorCores.
    if tn >= n_up and n_up >= 2 * align:
        tn = _round_up(-(-n_up // 2), align)
    num_tiles = -(-n // tn)

    t2d = target.astype(jnp.int32).reshape(n, 1)
    compute_dtype = (jnp.bfloat16
                     if (bf16_ok and logits.dtype == jnp.bfloat16)
                     else jnp.float32)

    # Two double-buffered input streams (both charged to `budget`) + headroom.
    vmem_limit = int(2 * budget + (8 << 20))

    partials = pl.pallas_call(
        functools.partial(_focal_loss_kernel, gamma=float(gamma), n_total=n,
                          num_classes=c, tn=tn, compute_dtype=compute_dtype),
        out_shape=jax.ShapeDtypeStruct((num_tiles, 1, _OUT_LANES), jnp.float32),
        grid=(num_tiles,),
        in_specs=[
            pl.BlockSpec((tn, c), lambda i: (i, 0)),
            pl.BlockSpec((tn, 1), lambda i: (i, 0)),
        ],
        out_specs=pl.BlockSpec((1, 1, _OUT_LANES), lambda i: (i, 0, 0)),
        compiler_params=pltpu.CompilerParams(
            dimension_semantics=("parallel",),
            vmem_limit_bytes=vmem_limit,
        ),
        cost_estimate=pl.CostEstimate(
            flops=int(6 * n * c),
            transcendentals=int(n * c + 3 * n),
            bytes_accessed=int(n * row_bytes + num_tiles * _OUT_LANES * 4),
        ),
    )(logits, t2d)

    # Tiny reduction over per-tile partials outside the kernel; mean over valid
    # targets (== N whenever all targets are in range, i.e. the PyTorch case).
    valid = (target >= 0) & (target < c)
    n_valid = jnp.maximum(jnp.sum(valid).astype(jnp.float32), 1.0)
    return -jnp.sum(partials[:, 0, 0]) / n_valid


def _focal_loss_ref(logits, target, gamma=0.5):
    logits = logits.astype(jnp.float32)
    logpt = jax.nn.log_softmax(logits, axis=1)
    pt = jnp.exp(logpt)
    mod = (1.0 - pt) ** gamma * logpt
    picked = jnp.take_along_axis(mod, target[:, None].astype(jnp.int32), axis=1)[:, 0]
    return -jnp.mean(picked)


if __name__ == "__main__":
    key = jax.random.PRNGKey(0)

    def _check(n, c, gamma, key):
        kx, kt, key = jax.random.split(key, 3)
        x = jax.random.normal(kx, (n, c), dtype=jnp.float32)
        t = jax.random.randint(kt, (n,), 0, c, dtype=jnp.int32)
        loss = jax.block_until_ready(focal_loss(x, t, gamma=gamma))
        ref = jax.block_until_ready(_focal_loss_ref(x, t, gamma=gamma))
        assert jnp.allclose(loss, ref, atol=1e-5, rtol=1e-5), (n, c, gamma, loss, ref)
        return key

    key = _check(8, 16, 0.5, key)    # small, aligned
    key = _check(13, 10, 2.0, key)   # unaligned N -> padded-row masking, gamma=2
    key = _check(300, 7, 1.0, key)   # multi-tile (>=2 parallel grid steps), small C

    print("KERNEL_OK")
</pallas_src>

<mosaic_0001>
module attributes {stable_mosaic.version = 11 : i64} {
  func.func @_focal_loss_kernel(%arg0: i32, %arg1: memref<8x16xf32, #tpu.memory_space<vmem>>, %arg2: memref<8x1xi32, #tpu.memory_space<vmem>>, %arg3: memref<1x1x128xf32, #tpu.memory_space<vmem>>) attributes {dimension_semantics = [#tpu.dimension_semantics<parallel>], iteration_bounds = array<i64: 1>, scalar_prefetch = 0 : i64, scratch_operands = 0 : i64, tpu.core_type = #tpu.core_type<tc>, window_params = [{transform_indices = @transform_0, window_bounds = array<i64: 8, 16>}, {transform_indices = @transform_1, window_bounds = array<i64: 8, 1>}, {transform_indices = @transform_2, window_bounds = array<i64: 1, 1, 128>}]} {
    %c0 = arith.constant 0 : index
    %c0_0 = arith.constant 0 : index
    %0 = vector.load %arg1[%c0, %c0_0] : memref<8x16xf32, #tpu.memory_space<vmem>>, vector<8x16xf32>
    %c0_1 = arith.constant 0 : index
    %c0_2 = arith.constant 0 : index
    %1 = vector.load %arg2[%c0_1, %c0_2] : memref<8x1xi32, #tpu.memory_space<vmem>>, vector<8x1xi32>
    %2 = tpu.iota {dimensions = array<i32: 1>} : vector<1x16xi32>
    %3 = vector.broadcast %2 : vector<1x16xi32> to vector<8x16xi32>
    %4 = vector.broadcast %1 : vector<8x1xi32> to vector<8x16xi32>
    %5 = arith.cmpi eq, %3, %4 : vector<8x16xi32>
    %cst = arith.constant 0.000000e+00 : f32
    %6 = vector.broadcast %cst : f32 to vector<8x16xf32>
    %7 = arith.select %5, %0, %6 : vector<8x16xi1>, vector<8x16xf32>
    %cst_3 = arith.constant dense<0.000000e+00> : vector<8xf32>
    %8 = vector.multi_reduction <add>, %7, %cst_3 [1] : vector<8x16xf32> to vector<8xf32>
    %9 = vector.shape_cast %8 : vector<8xf32> to vector<8x1xf32>
    %cst_4 = arith.constant dense<0xFF800000> : vector<8xf32>
    %10 = vector.multi_reduction <maximumf>, %0, %cst_4 [1] : vector<8x16xf32> to vector<8xf32>
    %11 = vector.shape_cast %10 : vector<8xf32> to vector<8x1xf32>
    %12 = vector.broadcast %11 : vector<8x1xf32> to vector<8x16xf32>
    %13 = arith.subf %0, %12 : vector<8x16xf32>
    %14 = math.exp %13 : vector<8x16xf32>
    %cst_5 = arith.constant dense<0.000000e+00> : vector<8xf32>
    %15 = vector.multi_reduction <add>, %14, %cst_5 [1] : vector<8x16xf32> to vector<8xf32>
    %16 = vector.shape_cast %15 : vector<8xf32> to vector<8x1xf32>
    %17 = math.log %16 : vector<8x1xf32>
    %18 = arith.addf %17, %11 : vector<8x1xf32>
    %19 = arith.subf %9, %18 : vector<8x1xf32>
    %20 = math.exp %19 : vector<8x1xf32>
    %cst_6 = arith.constant 1.000000e+00 : f32
    %21 = vector.broadcast %cst_6 : f32 to vector<8x1xf32>
    %22 = arith.subf %21, %20 : vector<8x1xf32>
    %cst_7 = arith.constant 0.000000e+00 : f32
    %23 = vector.broadcast %cst_7 : f32 to vector<8x1xf32>
    %24 = arith.maximumf %22, %23 : vector<8x1xf32>
    %25 = math.sqrt %24 : vector<8x1xf32>
    %26 = arith.mulf %25, %19 : vector<8x1xf32>
    %c8_i32 = arith.constant 8 : i32
    %27 = arith.muli %arg0, %c8_i32 : i32
    %28 = tpu.iota {dimensions = array<i32: 0>} : vector<8x1xi32>
    %29 = vector.broadcast %27 : i32 to vector<8x1xi32>
    %30 = arith.addi %29, %28 : vector<8x1xi32>
    %c8_i32_8 = arith.constant 8 : i32
    %31 = vector.broadcast %c8_i32_8 : i32 to vector<8x1xi32>
    %32 = arith.cmpi slt, %30, %31 : vector<8x1xi32>
    %c0_i32 = arith.constant 0 : i32
    %33 = vector.broadcast %c0_i32 : i32 to vector<8x1xi32>
    %34 = arith.cmpi sge, %1, %33 : vector<8x1xi32>
    %35 = arith.andi %32, %34 : vector<8x1xi1>
    %c16_i32 = arith.constant 16 : i32
    %36 = vector.broadcast %c16_i32 : i32 to vector<8x1xi32>
    %37 = arith.cmpi slt, %1, %36 : vector<8x1xi32>
    %38 = arith.andi %35, %37 : vector<8x1xi1>
    %cst_9 = arith.constant 0.000000e+00 : f32
    %39 = vector.broadcast %cst_9 : f32 to vector<8x1xf32>
    %40 = arith.select %38, %26, %39 : vector<8x1xi1>, vector<8x1xf32>
    %41 = vector.shape_cast %40 : vector<8x1xf32> to vector<1x8x1xf32>
    %cst_10 = arith.constant dense<0.000000e+00> : vector<1xf32>
    %42 = vector.multi_reduction <add>, %41, %cst_10 [1, 2] : vector<1x8x1xf32> to vector<1xf32>
    %43 = vector.shape_cast %42 : vector<1xf32> to vector<1x1x1xf32>
    %44 = vector.extract %43[0, 0, 0] : f32 from vector<1x1x1xf32>
    %45 = vector.broadcast %44 : f32 to vector<1x1x128xf32>
    %c0_11 = arith.constant 0 : index
    %c0_12 = arith.constant 0 : index
    %c0_13 = arith.constant 0 : index
    %46 = vector.load %arg3[%c0_11, %c0_12, %c0_13] : memref<1x1x128xf32, #tpu.memory_space<vmem>>, vector<1x1x128xf32>
    tpu.vector_store %arg3[%c0_11, %c0_12, %c0_13], %45 {strides = array<i32>} : memref<1x1x128xf32, #tpu.memory_space<vmem>>, vector<1x1x128xf32>,
    return
  }
  func.func @transform_0(%arg0: i32) -> (i32, i32) {
    %c0_i32 = arith.constant 0 : i32
    %c0_i32_0 = arith.constant 0 : i32
    return %arg0, %c0_i32 : i32, i32
  }
  func.func @transform_1(%arg0: i32) -> (i32, i32) {
    %c0_i32 = arith.constant 0 : i32
    %c0_i32_0 = arith.constant 0 : i32
    return %arg0, %c0_i32 : i32, i32
  }
  func.func @transform_2(%arg0: i32) -> (i32, i32, i32) {
    %c0_i32 = arith.constant 0 : i32
    %c0_i32_0 = arith.constant 0 : i32
    %c0_i32_1 = arith.constant 0 : i32
    return %arg0, %c0_i32, %c0_i32_0 : i32, i32, i32
  }
}

</mosaic_0001>

<bundles_post_ra>
// kernel: tpu_custom_call.1
= control target key start
LH: loop header
LB: loop body
LE: loop exit
PB: predicated region body
PF: predicated region fallthrough
CT: control target
= control target key end

     0   :  { %vm21_vm0 = vcmask 130048   ;;  %s152_s0 = inlined_call_operand.vmem [shape: f32[8,16], index: 0, kind: input, shape index: {}]   ;;  %s153_s1 = inlined_call_operand.vmem [shape: s32[8,1], index: 1, kind: input, shape index: {}]   ;;  %s154_s2 = inlined_call_operand.hbm [shape: f32[1,1,128], index: 2, kind: output, shape index: {}]  }
   0x1   :  { %v12_v0 = vld [vmem:[%s152_s0] sm:$0xff] }
   0x2   :  { %7 = vsyncpa [#allocation3], 0  ;;  %v25_v1 = vsel %vm21_vm0, %v12_v0, -inf  ;;  %v123_v2 = vmov 0   ;;  %v13_v3 = vld [vmem:[%s153_s1] sm:$0xff]  ;;  %v14_v7 = vlaneseq  ;;  %vm61_vm7 = vcmask 7168  }
   0x3   :  { %92 = vset.pattern.permute.xlu0 %v123_v2  ;;  %vm56_vm2 = vcmp.ge.s32.totalorder %v13_v3, 0  ;;  %vm58_vm3 = vcmp.lt.s32.totalorder %v13_v3, 16  ;;  %s124_s0 = smov [#allocation2]  }
   0x4   :  { %26 = vmax.xlane.f32.xlu0 %v25_v1  ;;  %v15_v8 = vand.u32 127, %v14_v7  ;;  %vm59_vm6 = vmand %vm56_vm2, %vm58_vm3  ;;  %s80_s1 = sshll.u32 %s124_s0, 4  ;;  %s81_s1 = int_to_ptr.vmem [resolvable:$true] %s80_s1 }
   0x5   :  { %s101_s14 = scalar_lea.vmem %s81_s1, 16  ;;  %s105_s15 = scalar_lea.vmem %s81_s1, 32 }
   0x6   :  { %p102_p0 = scmp.ne.s32.totalorder %s81_s1, %s101_s14  ;;  %p106_p1 = scmp.lt.s32.totalorder %s81_s1, %s81_s1 }
   0x7   :  { %p107_p2 = scmp.lt.s32.totalorder %s105_s15, %s101_s14 }
   0x9   :  { %p108_p3 = por %p107_p2, %p106_p1 }
   0xb   :  { %p109_p4 = pnand %p108_p3, %p102_p0 }
  0x1a   :  { %17 = vperm.xlu0 %92, %v13_v3  }
  0x8d   :  { %v27_v4 = vpop.xlane.xlu0 %26 }
  0x8e   :  { %v28_v5 = vsub.f32 %v12_v0, %v27_v4 }
  0x90   :  { %v29_v6 = vmul.f32 1.442695, %v28_v5 }
  0x92   :  { %93 = vpow2.f32 %v29_v6 }
  0x95   :  { %v18_v9 = vpop.permute.xlu0 %17 }
  0x96   :  { %vm19_vm1 = vcmp.eq.s32.totalorder %v15_v8, %v18_v9 }
  0x97   :  { %v20_v11 = vsel %vm19_vm1, %v12_v0, 0.0 }
  0x98   :  { %v22_v13 = vsel %vm21_vm0, %v20_v11, 0.0 }
  0x9f   :  { %v94_v10 = vpop.eup %93 }
  0xa0   :  { %v31_v12 = vsel %vm21_vm0, %v94_v10, 0.0 }
  0xa1   :  { %32 = vadd.xlane.f32.xlu1 %v31_v12 }
  0xa5   :  { %23 = vadd.xlane.f32.xlu1 %v22_v13 }
 0x12a   :  { %v33_v14 = vpop.xlane.xlu1 %32 }
 0x12b   :  { %95 = vlog2.f32 %v33_v14 }
 0x12e   :  { %v24_v17 = vpop.xlane.xlu1 %23 }
 0x138   :  { %v96_v15 = vpop.eup %95 }
 0x139   :  { %v35_v16 = vmul.f32 0.6931472, %v96_v15 }
 0x13b   :  { %v36_v18 = vadd.f32 %v35_v16, %v27_v4 }
 0x13d   :  { %v37_v19 = vsub.f32 %v24_v17, %v36_v18 }
 0x13f   :  { %v38_v20 = vmul.f32 1.442695, %v37_v19 }
 0x141   :  { %97 = vpow2.f32 %v38_v20 }
 0x14e   :  { %v98_v21 = vpop.eup %97 }
 0x14f   :  { %v40_v22 = vsub.f32 1.0, %v98_v21 }
 0x151   :  { %v41_v23 = vmax.f32 %v40_v22, 0.0 }
 0x153   :  { %99 = vrsqrt.f32 %v41_v23  ;;  %vm44_vm4 = vcmp.eq.f32.partialorder %v41_v23, inf  ;;  %v47_v26 = vand.u32 2147483648, %v41_v23  ;;  %vm46_vm5 = vcmp.eq.f32.partialorder %v41_v23, 0.0 }
 0x160   :  { %v100_v24 = vpop.eup %99 }
 0x161   :  { %v43_v25 = vmul.f32 %v100_v24, %v41_v23 }
 0x163   :  { %v45_v27 = vsel %vm44_vm4, %v41_v23, %v43_v25 }
 0x164   :  { %v48_v28 = vsel %vm46_vm5, %v47_v26, %v45_v27 }
 0x165   :  { %v49_v29 = vmul.f32 %v48_v28, %v37_v19 }
 0x167   :  { %v60_v30 = vsel %vm59_vm6, %v49_v29, 0.0 }
 0x168   :  { %v62_v31 = vsel %vm61_vm7, %v60_v30, 0.0 }
 0x169   :  { %63 = vadd.xlane.f32.xlu1 %v62_v31 }
 0x1f2   :  { %v64_v32 = vpop.xlane.xlu1 %63 }
 0x1f3   :  { %v65_v33 = vrot.slane %v64_v32, 4 }
 0x1f5   :  { %v66_v34 = vadd.f32 %v65_v33, %v64_v32 }
 0x1f7   :  { %v67_v35 = vrot.slane %v66_v34, 2 }
 0x1f9   :  { %v68_v36 = vadd.f32 %v67_v35, %v66_v34 }
 0x1fb   :  { %v69_v37 = vrot.slane %v68_v36, 1 }
 0x1fd   :  { %v70_v38 = vadd.f32 %v69_v37, %v68_v36 }
 0x1ff   :  { %88 = vpush %v70_v38 }
 0x230   :  { %s89_s13 = spop %88 }
 0x231   :  { %v72_v39 = vstv %s89_s13 }
 0x232   :  { %73 = vst [vmem:[#allocation2] sm:$0x1] %v72_v39 }
 0x233   :  { %112 = shalt.err (!%p109_p4)
}
 0x234   :  { %83 = dma.vmem_to_hbm [thread:$0]  %s81_s1, 16, %s154_s2, [#allocation3]  }
 0x235   :  { %121 = dma.done.wait [#allocation3], 16  }
 0x236   :  { %122 = vsyncadd [#allocation3], 4294967280 }
 0x237   :  { %87 = vsyncpa [#allocation3], 1 }

</bundles_post_ra>
